<compile_context>
chip_gen: v7x
topology: tpu7x:2x2x1
jax: 0.10.0
libtpu: 0.0.40
codegen_flags: <defaults>
</compile_context>

<pallas_src>
import jax
import jax.numpy as jnp
from jax.experimental import pallas as pl
from jax.experimental.pallas import tpu as pltpu


# ---------------------------------------------------------------------------
# Kernel 1: 4 GCN layers + pre-contraction of y with the split first MLP weight.
# Gridless, fully VMEM-resident. Output z_ext (kpad, Hm):
#   rows [0, N)       : y @ w1[:q]      (origin contribution per node)
#   rows [N, 2N)      : y @ w1[q:2q]    (destination contribution per node)
#   rows [2N, kpad-1) : zeros           (sublane padding to a multiple of 8)
#   row  kpad-1       : w1[2q]          (cost-column weight row)
# ---------------------------------------------------------------------------
def _gcn_zext_kernel(a_ref, x_ref, win_ref, whid_ref, wout_ref, b_ref, w1_ref,
                     z_ref):
    f32 = jnp.float32
    n = a_ref.shape[0]
    hg = win_ref.shape[1]
    qp = wout_ref.shape[1]              # gcn output width, padded to a mult. of 8

    a = a_ref[...]
    gin_b = b_ref[0:1, :hg]
    ghid_b = b_ref[1:2, :hg]
    gout_b = b_ref[2:3, :qp]

    # A @ X @ W + b (DGL send/sum-reduce == A @ h); ReLU on the first three layers,
    # hidden-layer weights reused twice, as in the original module.
    h = jnp.dot(a, x_ref[...], preferred_element_type=f32)
    h = jnp.maximum(jnp.dot(h, win_ref[...], preferred_element_type=f32) + gin_b, 0.0)
    h = jnp.dot(a, h, preferred_element_type=f32)
    h = jnp.maximum(jnp.dot(h, whid_ref[...], preferred_element_type=f32) + ghid_b, 0.0)
    h = jnp.dot(a, h, preferred_element_type=f32)
    h = jnp.maximum(jnp.dot(h, whid_ref[...], preferred_element_type=f32) + ghid_b, 0.0)
    h = jnp.dot(a, h, preferred_element_type=f32)
    y = jnp.dot(h, wout_ref[...], preferred_element_type=f32) + gout_b      # (N, qp)

    w1 = w1_ref[...]                    # (2*qp + 1, Hm); blocks 8-aligned by the wrapper
    z_i = jnp.dot(y, w1[0:qp, :], preferred_element_type=f32)               # (N, Hm)
    z_j = jnp.dot(y, w1[qp:2 * qp, :], preferred_element_type=f32)          # (N, Hm)

    pad_rows = z_ref.shape[0] - 2 * n - 1
    pieces = [z_i, z_j]
    if pad_rows:
        pieces.append(jnp.zeros((pad_rows, z_ref.shape[1]), f32))
    pieces.append(w1[2 * qp:2 * qp + 1, :])                                 # cost row last
    z_ref[...] = jnp.concatenate(pieces, axis=0)


# ---------------------------------------------------------------------------
# Kernel 2: pairing + 3-layer MLP over a tile of TM pairs (lane axis = pairs).
# Gridded over pair tiles, dimension_semantics=("parallel",).
# ---------------------------------------------------------------------------
def _pair_mlp_kernel(zt_ref, idx_ref, cost_ref, w2t_ref, cols_ref, o_ref):
    f32 = jnp.float32
    kdim = zt_ref.shape[1]              # padded selector length (>= 2N+1), cost row last
    tm = idx_ref.shape[1]               # pairs in this tile (lane axis)

    # Selector (kdim, TM), lane-dense over pairs:
    #   sel[c, m] = 1       if c == i_m        (picks the y[i] block of z_ext)
    #             = 1       if c == j_m + N    (picks the y[j] block)
    #             = cost_m  if c == kdim-1     (picks the w1 cost row)
    row = jax.lax.broadcasted_iota(jnp.int32, (kdim, tm), 0)
    onehot = jnp.logical_or(row == idx_ref[0:1, :],
                            row == idx_ref[1:2, :]).astype(f32)
    sel = onehot + (row == kdim - 1).astype(f32) * cost_ref[...]

    cols = cols_ref[...]                # [b1 | b2 | w3 | b3] columns, (Hm, 4)

    # Gather + cost + first MLP layer in ONE MXU pass (transposed: Hm on sublanes,
    # pairs on lanes), then the remaining layers, all lane-dense in the pair dim.
    h1 = jnp.maximum(jnp.dot(zt_ref[...], sel, preferred_element_type=f32)
                     + cols[:, 0:1], 0.0)                                    # (Hm, TM)
    h2 = jnp.maximum(jnp.dot(w2t_ref[...], h1, preferred_element_type=f32)
                     + cols[:, 1:2], 0.0)                                    # (Hm, TM)
    # Final 1-unit layer as a sublane reduction (XLU) instead of an N=1 matmul.
    o_ref[...] = (jnp.sum(h2 * cols[:, 2:3], axis=0, keepdims=True)
                  + cols[0:1, 3:4])                                          # (1, TM)


# ---------------------------------------------------------------------------
# Wrapper
# ---------------------------------------------------------------------------
def od_forward(params, adjacency, pois, costs, indices, q, zone_count,
               pair_tile=128):
    """Forward of the `od` module. Returns (num_pairs, 1) float32."""
    n = adjacency.shape[0]
    assert n == zone_count
    hg = params["gin_w"].shape[1]
    gcn_out = params["gout_w"].shape[1]
    hm = params["w2"].shape[0]
    m = int(indices.shape[0])

    # The torch forward writes the full y[i] row into a width-q slot, which only
    # works when the GCN output width equals q.
    assert q == gcn_out, "od.forward requires q == gcn output width"
    assert params["w1"].shape[0] == 2 * q + 1

    # ---- pack / pad parameters (wrapper-side layout plumbing, free) ----
    qp = -(-gcn_out // 8) * 8                         # pad q to a sublane multiple
    gout_w = jnp.pad(params["gout_w"], ((0, 0), (0, qp - gcn_out)))
    bw = max(hg, qp)
    b_gcn = jnp.concatenate([
        jnp.pad(params["gin_b"], ((0, 0), (0, bw - hg))),
        jnp.pad(params["ghid_b"], ((0, 0), (0, bw - hg))),
        jnp.pad(params["gout_b"], ((0, 0), (0, bw - gcn_out)))], axis=0)   # (3, bw)
    w1 = params["w1"]
    w1_packed = jnp.concatenate([
        jnp.pad(w1[:q], ((0, qp - q), (0, 0))),
        jnp.pad(w1[q:2 * q], ((0, qp - q), (0, 0))),
        w1[2 * q:2 * q + 1]], axis=0)                                      # (2qp+1, Hm)

    kpad = -(-(2 * n + 1) // 8) * 8

    vmem = pl.BlockSpec(memory_space=pltpu.MemorySpace.VMEM)
    z_ext = pl.pallas_call(
        _gcn_zext_kernel,
        out_shape=jax.ShapeDtypeStruct((kpad, hm), jnp.float32),
        in_specs=[vmem] * 7,
        out_specs=vmem,
    )(adjacency, pois, params["gin_w"], params["ghid_w"], gout_w, b_gcn,
      w1_packed)

    # Transpose once in the wrapper so the pair/MLP stage is lane-dense in the
    # pair dimension (tiny (kpad, Hm) array; pure layout plumbing).
    z_t = z_ext.T                                                          # (Hm, kpad)

    # ---- pair-stage inputs: lane-dense rows, M padded to a 128 multiple ----
    tm = pair_tile
    m_pad = -(-m // tm) * tm
    pad = m_pad - m
    idx = indices.astype(jnp.int32)
    iidx = jnp.pad(idx // zone_count, (0, pad))
    jidx = jnp.pad(idx % zone_count, (0, pad))
    idx2 = jnp.stack([iidx, jidx + zone_count], axis=0)                    # (2, m_pad)
    cost_row = jnp.pad(costs[idx, 0], (0, pad)).reshape(1, m_pad)          # (1, m_pad)

    w2t = params["w2"].T
    mlp_cols = jnp.concatenate([
        params["b1"].T, params["b2"].T, params["w3"],
        jnp.broadcast_to(params["b3"], (hm, 1))], axis=1)                  # (Hm, 4)

    out_row = pl.pallas_call(
        _pair_mlp_kernel,
        out_shape=jax.ShapeDtypeStruct((1, m_pad), jnp.float32),
        grid=(m_pad // tm,),
        in_specs=[
            pl.BlockSpec((hm, kpad), lambda i: (0, 0)),       # z_ext^T (replicated)
            pl.BlockSpec((2, tm), lambda i: (0, i)),          # pair indices (lane-dense)
            pl.BlockSpec((1, tm), lambda i: (0, i)),          # gathered costs
            pl.BlockSpec((hm, hm), lambda i: (0, 0)),         # w2^T
            pl.BlockSpec((hm, 4), lambda i: (0, 0)),          # [b1|b2|w3|b3]
        ],
        out_specs=pl.BlockSpec((1, tm), lambda i: (0, i)),
        compiler_params=pltpu.CompilerParams(
            dimension_semantics=("parallel",)),
    )(z_t, idx2, cost_row, w2t, mlp_cols)

    return out_row[0, :m].reshape(m, 1)   # match torch output layout (num_pairs, 1)


# ---------------------------------------------------------------------------
# Pure-JAX reference (mirrors the PyTorch forward) for validation
# ---------------------------------------------------------------------------
def od_reference(params, adjacency, pois, costs, indices, q, zone_count):
    def layer(x, w, b, relu):
        h = jnp.dot(jnp.dot(adjacency, x), w) + b
        return jnp.maximum(h, 0.0) if relu else h

    y = layer(pois, params["gin_w"], params["gin_b"], True)
    y = layer(y, params["ghid_w"], params["ghid_b"], True)
    y = layer(y, params["ghid_w"], params["ghid_b"], True)
    y = layer(y, params["gout_w"], params["gout_b"], False)

    yq = y[:, :q]
    p = jnp.concatenate(
        [jnp.repeat(yq, zone_count, axis=0), jnp.tile(yq, (zone_count, 1))], axis=1)
    p = p[indices]
    c = costs[indices]
    inputs = jnp.concatenate([p, c], axis=1)

    h = jnp.maximum(jnp.dot(inputs, params["w1"]) + params["b1"], 0.0)
    h = jnp.maximum(jnp.dot(h, params["w2"]) + params["b2"], 0.0)
    return jnp.dot(h, params["w3"]) + params["b3"]


# ---------------------------------------------------------------------------
# Parameter init (deterministic, torch.nn.Linear-style uniform(+-1/sqrt(fan_in)))
# ---------------------------------------------------------------------------
def _init_linear(key, fan_in, fan_out):
    kw, kb = jax.random.split(key)
    bound = 1.0 / jnp.sqrt(jnp.float32(fan_in))
    w = jax.random.uniform(kw, (fan_in, fan_out), jnp.float32, -bound, bound)
    b = jax.random.uniform(kb, (1, fan_out), jnp.float32, -bound, bound)
    return w, b


def init_od_params(key, gcn_input, gcn_hidden, gcn_output, mlp_hidden, gcnoutput=10):
    keys = jax.random.split(key, 6)
    p = {}
    p["gin_w"], p["gin_b"] = _init_linear(keys[0], gcn_input, gcn_hidden)
    p["ghid_w"], p["ghid_b"] = _init_linear(keys[1], gcn_hidden, gcn_hidden)
    p["gout_w"], p["gout_b"] = _init_linear(keys[2], gcn_hidden, gcn_output)
    mlp_in = 2 * gcnoutput + 1
    p["w1"], p["b1"] = _init_linear(keys[3], mlp_in, mlp_hidden)
    p["w2"], p["b2"] = _init_linear(keys[4], mlp_hidden, mlp_hidden)
    p["w3"], p["b3"] = _init_linear(keys[5], mlp_hidden, 1)
    return p


# ---------------------------------------------------------------------------
# main
# ---------------------------------------------------------------------------
if __name__ == "__main__":
    gcnoutput = 10            # module-level constant in the original file
    zone_count = 8            # number of graph nodes / zones
    gcn_input = 16
    gcn_hidden = 32
    gcn_out = gcnoutput       # must equal q for the slicing in od.forward
    mlp_hidden = 32
    q = gcnoutput
    num_pairs = 32

    key = jax.random.PRNGKey(0)
    k_param, k_adj, k_pois, k_cost, k_idx = jax.random.split(key, 5)

    params = init_od_params(k_param, gcn_input, gcn_hidden, gcn_out, mlp_hidden,
                            gcnoutput=gcnoutput)

    # adjacency with A[dst, src] = 1.0 (random directed graph + self loops)
    adjacency = (jax.random.uniform(k_adj, (zone_count, zone_count)) > 0.5
                 ).astype(jnp.float32)
    adjacency = jnp.maximum(adjacency, jnp.eye(zone_count, dtype=jnp.float32))

    pois = jax.random.normal(k_pois, (zone_count, gcn_input), jnp.float32)
    costs = jax.random.uniform(k_cost, (zone_count * zone_count, 1), jnp.float32)
    # deterministic subset of (origin, destination) pairs
    indices = jax.random.permutation(k_idx, zone_count * zone_count)[:num_pairs]

    out = od_forward(params, adjacency, pois, costs, indices, q, zone_count)
    out = jax.block_until_ready(out)
    assert out.shape == (num_pairs, 1) and out.dtype == jnp.float32

    # validate the kernels against a pure-JAX reference of the PyTorch forward
    with jax.default_matmul_precision("highest"):
        ref = od_reference(params, adjacency, pois, costs, indices, q, zone_count)
    assert jnp.allclose(out, ref, rtol=5e-3, atol=5e-3), (
        "max abs err = %g" % float(jnp.max(jnp.abs(out - ref))))

    print("KERNEL_OK")
</pallas_src>

<mosaic_0001>
module attributes {stable_mosaic.version = 11 : i64} {
  func.func @_gcn_zext_kernel(%arg0: memref<8x8xf32, #tpu.memory_space<vmem>>, %arg1: memref<8x16xf32, #tpu.memory_space<vmem>>, %arg2: memref<16x32xf32, #tpu.memory_space<vmem>>, %arg3: memref<32x32xf32, #tpu.memory_space<vmem>>, %arg4: memref<32x16xf32, #tpu.memory_space<vmem>>, %arg5: memref<3x32xf32, #tpu.memory_space<vmem>>, %arg6: memref<33x32xf32, #tpu.memory_space<vmem>>, %arg7: memref<24x32xf32, #tpu.memory_space<vmem>>) attributes {dimension_semantics = [], scalar_prefetch = 0 : i64, scratch_operands = 0 : i64, tpu.core_type = #tpu.core_type<tc>} {
    %c0 = arith.constant 0 : index
    %c0_0 = arith.constant 0 : index
    %0 = vector.load %arg0[%c0, %c0_0] : memref<8x8xf32, #tpu.memory_space<vmem>>, vector<8x8xf32>
    %c0_1 = arith.constant 0 : index
    %c0_2 = arith.constant 0 : index
    %1 = vector.load %arg5[%c0_1, %c0_2] : memref<3x32xf32, #tpu.memory_space<vmem>>, vector<1x32xf32>
    %c1 = arith.constant 1 : index
    %c0_3 = arith.constant 0 : index
    %2 = vector.load %arg5[%c1, %c0_3] : memref<3x32xf32, #tpu.memory_space<vmem>>, vector<1x32xf32>
    %c2 = arith.constant 2 : index
    %c0_4 = arith.constant 0 : index
    %3 = vector.load %arg5[%c2, %c0_4] : memref<3x32xf32, #tpu.memory_space<vmem>>, vector<1x16xf32>
    %c0_5 = arith.constant 0 : index
    %c0_6 = arith.constant 0 : index
    %4 = vector.load %arg1[%c0_5, %c0_6] : memref<8x16xf32, #tpu.memory_space<vmem>>, vector<8x16xf32>
    %cst = arith.constant dense<0.000000e+00> : vector<8x16xf32>
    %5 = tpu.matmul %0, %4, %cst {dimension_numbers = #tpu.dot_dimension_numbers<[1], [0], [0], [1], [0, 0, 1, 1], [], []>} : vector<8x8xf32>, vector<8x16xf32>, vector<8x16xf32> -> vector<8x16xf32>
    %c0_7 = arith.constant 0 : index
    %c0_8 = arith.constant 0 : index
    %6 = vector.load %arg2[%c0_7, %c0_8] : memref<16x32xf32, #tpu.memory_space<vmem>>, vector<16x32xf32>
    %cst_9 = arith.constant dense<0.000000e+00> : vector<8x32xf32>
    %7 = tpu.matmul %5, %6, %cst_9 {dimension_numbers = #tpu.dot_dimension_numbers<[1], [0], [0], [1], [0, 0, 1, 1], [], []>} : vector<8x16xf32>, vector<16x32xf32>, vector<8x32xf32> -> vector<8x32xf32>
    %8 = vector.broadcast %1 : vector<1x32xf32> to vector<8x32xf32>
    %9 = arith.addf %7, %8 : vector<8x32xf32>
    %cst_10 = arith.constant 0.000000e+00 : f32
    %10 = vector.broadcast %cst_10 : f32 to vector<8x32xf32>
    %11 = arith.maximumf %9, %10 : vector<8x32xf32>
    %cst_11 = arith.constant dense<0.000000e+00> : vector<8x32xf32>
    %12 = tpu.matmul %0, %11, %cst_11 {dimension_numbers = #tpu.dot_dimension_numbers<[1], [0], [0], [1], [0, 0, 1, 1], [], []>} : vector<8x8xf32>, vector<8x32xf32>, vector<8x32xf32> -> vector<8x32xf32>
    %c0_12 = arith.constant 0 : index
    %c0_13 = arith.constant 0 : index
    %13 = vector.load %arg3[%c0_12, %c0_13] : memref<32x32xf32, #tpu.memory_space<vmem>>, vector<32x32xf32>
    %cst_14 = arith.constant dense<0.000000e+00> : vector<8x32xf32>
    %14 = tpu.matmul %12, %13, %cst_14 {dimension_numbers = #tpu.dot_dimension_numbers<[1], [0], [0], [1], [0, 0, 1, 1], [], []>} : vector<8x32xf32>, vector<32x32xf32>, vector<8x32xf32> -> vector<8x32xf32>
    %15 = vector.broadcast %2 : vector<1x32xf32> to vector<8x32xf32>
    %16 = arith.addf %14, %15 : vector<8x32xf32>
    %cst_15 = arith.constant 0.000000e+00 : f32
    %17 = vector.broadcast %cst_15 : f32 to vector<8x32xf32>
    %18 = arith.maximumf %16, %17 : vector<8x32xf32>
    %cst_16 = arith.constant dense<0.000000e+00> : vector<8x32xf32>
    %19 = tpu.matmul %0, %18, %cst_16 {dimension_numbers = #tpu.dot_dimension_numbers<[1], [0], [0], [1], [0, 0, 1, 1], [], []>} : vector<8x8xf32>, vector<8x32xf32>, vector<8x32xf32> -> vector<8x32xf32>
    %c0_17 = arith.constant 0 : index
    %c0_18 = arith.constant 0 : index
    %20 = vector.load %arg3[%c0_17, %c0_18] : memref<32x32xf32, #tpu.memory_space<vmem>>, vector<32x32xf32>
    %cst_19 = arith.constant dense<0.000000e+00> : vector<8x32xf32>
    %21 = tpu.matmul %19, %20, %cst_19 {dimension_numbers = #tpu.dot_dimension_numbers<[1], [0], [0], [1], [0, 0, 1, 1], [], []>} : vector<8x32xf32>, vector<32x32xf32>, vector<8x32xf32> -> vector<8x32xf32>
    %22 = vector.broadcast %2 : vector<1x32xf32> to vector<8x32xf32>
    %23 = arith.addf %21, %22 : vector<8x32xf32>
    %cst_20 = arith.constant 0.000000e+00 : f32
    %24 = vector.broadcast %cst_20 : f32 to vector<8x32xf32>
    %25 = arith.maximumf %23, %24 : vector<8x32xf32>
    %cst_21 = arith.constant dense<0.000000e+00> : vector<8x32xf32>
    %26 = tpu.matmul %0, %25, %cst_21 {dimension_numbers = #tpu.dot_dimension_numbers<[1], [0], [0], [1], [0, 0, 1, 1], [], []>} : vector<8x8xf32>, vector<8x32xf32>, vector<8x32xf32> -> vector<8x32xf32>
    %c0_22 = arith.constant 0 : index
    %c0_23 = arith.constant 0 : index
    %27 = vector.load %arg4[%c0_22, %c0_23] : memref<32x16xf32, #tpu.memory_space<vmem>>, vector<32x16xf32>
    %cst_24 = arith.constant dense<0.000000e+00> : vector<8x16xf32>
    %28 = tpu.matmul %26, %27, %cst_24 {dimension_numbers = #tpu.dot_dimension_numbers<[1], [0], [0], [1], [0, 0, 1, 1], [], []>} : vector<8x32xf32>, vector<32x16xf32>, vector<8x16xf32> -> vector<8x16xf32>
    %29 = vector.broadcast %3 : vector<1x16xf32> to vector<8x16xf32>
    %30 = arith.addf %28, %29 : vector<8x16xf32>
    %c0_25 = arith.constant 0 : index
    %c0_26 = arith.constant 0 : index
    %31 = vector.load %arg6[%c0_25, %c0_26] : memref<33x32xf32, #tpu.memory_space<vmem>>, vector<33x32xf32>
    %32 = vector.extract_strided_slice %31 {offsets = [0, 0], sizes = [16, 32], strides = [1, 1]} : vector<33x32xf32> to vector<16x32xf32>
    %cst_27 = arith.constant dense<0.000000e+00> : vector<8x32xf32>
    %33 = tpu.matmul %30, %32, %cst_27 {dimension_numbers = #tpu.dot_dimension_numbers<[1], [0], [0], [1], [0, 0, 1, 1], [], []>} : vector<8x16xf32>, vector<16x32xf32>, vector<8x32xf32> -> vector<8x32xf32>
    %34 = vector.extract_strided_slice %31 {offsets = [16, 0], sizes = [16, 32], strides = [1, 1]} : vector<33x32xf32> to vector<16x32xf32>
    %cst_28 = arith.constant dense<0.000000e+00> : vector<8x32xf32>
    %35 = tpu.matmul %30, %34, %cst_28 {dimension_numbers = #tpu.dot_dimension_numbers<[1], [0], [0], [1], [0, 0, 1, 1], [], []>} : vector<8x16xf32>, vector<16x32xf32>, vector<8x32xf32> -> vector<8x32xf32>
    %cst_29 = arith.constant 0.000000e+00 : f32
    %36 = vector.broadcast %cst_29 : f32 to vector<7x32xf32>
    %37 = vector.extract_strided_slice %31 {offsets = [32, 0], sizes = [1, 32], strides = [1, 1]} : vector<33x32xf32> to vector<1x32xf32>
    %38 = tpu.concatenate %33, %35, %36, %37 in 0 : vector<8x32xf32>, vector<8x32xf32>, vector<7x32xf32>, vector<1x32xf32> -> vector<24x32xf32>
    %c0_30 = arith.constant 0 : index
    %c0_31 = arith.constant 0 : index
    %39 = vector.load %arg7[%c0_30, %c0_31] : memref<24x32xf32, #tpu.memory_space<vmem>>, vector<24x32xf32>
    tpu.vector_store %arg7[%c0_30, %c0_31], %38 {strides = array<i32>} : memref<24x32xf32, #tpu.memory_space<vmem>>, vector<24x32xf32>,
    return
  }
}

</mosaic_0001>

<bundles_post_ra>
// kernel: tpu_custom_call.1
= control target key start
LH: loop header
LB: loop body
LE: loop exit
PB: predicated region body
PF: predicated region fallthrough
CT: control target
= control target key end

     0   :  { %vm32_vm0 = vcmask 64512   ;;  %v983_v2 = vmov 0.0   ;;  %vm984_vm1 = vmmov 0   ;;  %s1153_s0 = inlined_call_operand.vmem [shape: f32[8,8], index: 0, kind: input, shape index: {}]   ;;  %s1154_s1 = inlined_call_operand.vmem [shape: f32[8,16], index: 1, kind: input, shape index: {}]   ;;  %s1155_s2 = inlined_call_operand.vmem [shape: f32[16,32], index: 2, kind: input, shape index: {}]   ;;  %s1156_s3 = inlined_call_operand.vmem [shape: f32[32,32], index: 3, kind: input, shape index: {}]   ;;  %s1157_s4 = inlined_call_operand.vmem [shape: f32[32,16], index: 4, kind: input, shape index: {}]   ;;  %s1158_s5 = inlined_call_operand.vmem [shape: f32[3,32], index: 5, kind: input, shape index: {}]   ;;  %s1159_s6 = inlined_call_operand.vmem [shape: f32[33,32], index: 6, kind: input, shape index: {}]   ;;  %s1160_s7 = inlined_call_operand.hbm [shape: f32[24,32], index: 7, kind: output, shape index: {}]  }
   0x1   :  { %v31_v0 = vld [vmem:[%s1154_s1] sm:$0xff]  ;;  %852 = vmatprep.subr.mxu0 %v983_v2  ;;  %854 = vmatprep.mubr.msk.f32.mxu0 %vm984_vm1, %v983_v2  ;;  %v107_v4 = vld [vmem:[%s1155_s2 + $0x8] sm:$0xff] }
   0x2   :  { %v1035_v1 = vld [vmem:[%s1153_s0] sm:$0xff] }
   0x3   :  { %v106_v3 = vld [vmem:[%s1155_s2] sm:$0xff] }
   0x4   :  { %12 = vsyncpa [#allocation3], 0  ;;  %853 = vmatpush3.msra.mxu0 %v31_v0  ;;  %v985_v5 = vmov 0.0|0.0   ;;  %v927_v6 = vpack.c.bf16 %v107_v4, %v106_v3  ;;  %861 = vmatprep.mubr.msk.f32.mxu1 %vm984_vm1, %v983_v2  ;;  %vm112_vm2 = vcmask 130048   ;;  %v257_v9 = vld [vmem:[%s1156_s3] sm:$0xff]  ;;  %v258_v10 = vld [vmem:[%s1156_s3 + $0x8] sm:$0xff] }
   0x5   :  { %926 = vmatprep.subr.bf16.mxu1 %v985_v5  ;;  %855 = vmatmul.mubr.msk.f32.vlgmr.msra.gmra.mrb[0].mxu0 %vm32_vm0, %v1035_v1  ;;  %v259_v11 = vld [vmem:[%s1156_s3 + $0x10] sm:$0xff]  ;;  %v930_v12 = vpack.c.bf16 %v258_v10, %v257_v9  ;;  %v260_v13 = vld [vmem:[%s1156_s3 + $0x18] sm:$0xff]  ;;  %v808_v15 = vld [vmem:[%s1158_s5] ss:$0 sm:$0xff]  ;;  %vm265_vm3 = vcmask 261120   ;;  %vm786_vm4 = vcmask 1046528  }
   0x6   :  { %928 = vmatpush3.bf16.msra.mxu1 %v927_v6  ;;  %864 = vmatprep.subr.mxu0 %v983_v2  ;;  %v933_v14 = vpack.c.bf16 %v260_v13, %v259_v11  ;;  %v811_v22 = vld [vmem:[%s1158_s5 + $0x1] ss:$0 sm:$0xff]  ;;  %v555_v31 = vld [vmem:[%s1157_s4 + $0x8] sm:$0xff]  ;;  %v556_v36 = vld [vmem:[%s1157_s4 + $0x10] sm:$0xff] }
   0x7   :  { %866 = vmatprep.mubr.msk.f32.mxu0 %vm984_vm1, %v983_v2  ;;  %929 = vmatprep.subr.bf16.mxu1 %v985_v5  ;;  %v554_v30 = vld [vmem:[%s1157_s4] sm:$0xff]  ;;  %v557_v37 = vld [vmem:[%s1157_s4 + $0x18] sm:$0xff]  ;;  %v636_v42 = vld [vmem:[%s1159_s6 + $0x8] sm:$0xff] }
   0x8   :  { %v942_v35 = vpack.c.bf16 %v555_v31, %v554_v30  ;;  %v945_v38 = vpack.c.bf16 %v557_v37, %v556_v36  ;;  %v635_v41 = vld [vmem:[%s1159_s6] sm:$0xff]  ;;  %v637_v44 = vld [vmem:[%s1159_s6 + $0x10] sm:$0xff]  ;;  %v638_v45 = vld [vmem:[%s1159_s6 + $0x18] sm:$0xff] }
   0x9   :  { %v948_v43 = vpack.c.bf16 %v636_v42, %v635_v41  ;;  %v816_v46 = vld [vmem:[%s1158_s5 + $0x2] ss:$0 sm:$0xff]  ;;  %v951_v48 = vpack.c.bf16 %v638_v45, %v637_v44  ;;  %v639_v51 = vld [vmem:[%s1159_s6 + $0x20] sm:$0x1]  ;;  %s986_s5 = smov [#allocation2]  }
   0xa   :  { %v784_v52 = vrot.slane %v639_v51, 1  ;;  %s796_s10 = sshll.u32 %s986_s5, 4  ;;  %s797_s10 = int_to_ptr.vmem [resolvable:$true] %s796_s10 }
   0xb   :  { %s959_s11 = scalar_lea.vmem %s797_s10, 384  ;;  %p964_p1 = scmp.lt.s32.totalorder %s797_s10, %s797_s10 }
   0xc   :  { %v787_v53 = vsel %vm786_vm4, 0.0, %v784_v52  ;;  %p960_p0 = scmp.ne.s32.totalorder %s797_s10, %s959_s11  ;;  %p965_p2 = scmp.lt.s32.totalorder %s959_s11, %s959_s11 }
   0xd   :  { %790 = vst.msk [vmem:[#allocation2 + $0x10] sm:$0xff] %vm265_vm3, %v787_v53 }
   0xe   :  { %p966_p3 = por %p965_p2, %p964_p1 }
  0x10   :  { %p967_p4 = pnand %p966_p3, %p960_p0 }
  0xd8   :  { %v102_v7 = vpop.f32.mrb[0].mxu0 }
  0xd9   :  { %v856_v8 = vpop.f32.mrb[1].mxu0  ;;  %862 = vmatmul.mubr.msk.f32.vlgmr.msra.gmra.mrb[0].mxu1 %vm112_vm2, %v102_v7 }
  0xda   :  { %877 = vmatprep.mubr.msk.f32.mxu1 %vm984_vm1, %v983_v2  ;;  %931 = vmatpush3.bf16.msra.mxu1 %v930_v12 }
  0xdb   :  { %932 = vmatprep.subr.bf16.mxu1 %v985_v5 }
  0xde   :  { %934 = vmatpush3.bf16.msra.mxu1 %v933_v14 }
  0xdf   :  { %896 = vmatprep.subr.mxu1 %v983_v2 }
 0x1ac   :  { %v182_v16 = vpop.f32.mrb[0].mxu1 }
 0x1ad   :  { %v183_v17 = vadd.f32 %v808_v15, %v182_v16  ;;  %v863_v18 = vpop.f32.mrb[1].mxu1 }
 0x1af   :  { %v186_v19 = vmax.f32 %v183_v17, 0.0 }
 0x1b1   :  { %865 = vmatpush3.msra.mxu0 %v186_v19 }
 0x1b2   :  { %867 = vmatmul.mubr.msk.f32.vlgmr.msra.gmra.mrb[2].mxu0 %vm32_vm0, %v1035_v1  ;;  %880 = vmatprep.subr.mxu0 %v983_v2 }
 0x1b3   :  { %882 = vmatprep.mubr.msk.f32.mxu0 %vm984_vm1, %v983_v2 }
 0x285   :  { %v253_v20 = vpop.f32.mrb[2].mxu0 }
 0x286   :  { %v868_v21 = vpop.f32.mrb[3].mxu0  ;;  %878 = vmatmul.mubr.msk.f32.vlgmr.msra.gmra.mrb[2].mxu1 %vm265_vm3, %v253_v20 }
 0x287   :  { %898 = vmatprep.mubr.msk.f32.mxu1 %vm984_vm1, %v983_v2 }
 0x359   :  { %v335_v23 = vpop.f32.mrb[2].mxu1 }
 0x35a   :  { %v336_v24 = vadd.f32 %v811_v22, %v335_v23  ;;  %v879_v25 = vpop.f32.mrb[3].mxu1 }
 0x35c   :  { %v339_v26 = vmax.f32 %v336_v24, 0.0 }
 0x35e   :  { %881 = vmatpush3.msra.mxu0 %v339_v26 }
 0x35f   :  { %883 = vmatmul.mubr.msk.f32.vlgmr.msra.gmra.mrb[4].mxu0 %vm32_vm0, %v1035_v1  ;;  %935 = vmatprep.subr.bf16.mxu0 %v985_v5 }
 0x360   :  { %937 = vmatpush3.bf16.msra.mxu0 %v930_v12  ;;  %893 = vmatprep.mubr.msk.f32.mxu0 %vm984_vm1, %v983_v2 }
 0x361   :  { %938 = vmatprep.subr.bf16.mxu0 %v985_v5 }
 0x364   :  { %940 = vmatpush3.bf16.msra.mxu0 %v933_v14 }
 0x365   :  { %947 = vmatprep.subr.bf16.mxu0 %v985_v5 }
 0x432   :  { %v406_v27 = vpop.f32.mrb[4].mxu0 }
 0x433   :  { %v884_v28 = vpop.f32.mrb[5].mxu0  ;;  %894 = vmatmul.mubr.msk.f32.vlgmr.msra.gmra.mrb[6].mxu0 %vm265_vm3, %v406_v27 }
 0x434   :  { %916 = vmatprep.mubr.msk.f32.mxu0 %vm984_vm1, %v983_v2  ;;  %949 = vmatpush3.bf16.msra.mxu0 %v948_v43 }
 0x435   :  { %950 = vmatprep.subr.bf16.mxu0 %v985_v5 }
 0x506   :  { %v479_v29 = vpop.f32.mrb[6].mxu0 }
 0x507   :  { %v480_v32 = vadd.f32 %v811_v22, %v479_v29  ;;  %v895_v33 = vpop.f32.mrb[7].mxu0 }
 0x509   :  { %v483_v34 = vmax.f32 %v480_v32, 0.0 }
 0x50b   :  { %897 = vmatpush3.msra.mxu1 %v483_v34 }
 0x50c   :  { %899 = vmatmul.mubr.msk.f32.vlgmr.msra.gmra.mrb[4].mxu1 %vm32_vm0, %v1035_v1  ;;  %941 = vmatprep.subr.bf16.mxu1 %v985_v5 }
 0x50d   :  { %943 = vmatpush3.bf16.msra.mxu1 %v942_v35  ;;  %909 = vmatprep.mubr.msk.f32.mxu1 %vm984_vm1, %v983_v2 }
 0x50e   :  { %944 = vmatprep.subr.bf16.mxu1 %v985_v5 }
 0x511   :  { %946 = vmatpush3.bf16.msra.mxu1 %v945_v38 }
 0x5df   :  { %v550_v39 = vpop.f32.mrb[4].mxu1 }
 0x5e0   :  { %910 = vmatmul.mubr.msk.f32.vlgmr.msra.gmra.mrb[6].mxu1 %vm265_vm3, %v550_v39  ;;  %v900_v40 = vpop.f32.mrb[5].mxu1 }
 0x6b3   :  { %v631_v47 = vpop.f32.mrb[6].mxu1 }
 0x6b4   :  { %v632_v49 = vadd.f32 %v816_v46, %v631_v47  ;;  %v911_v50 = vpop.f32.mrb[7].mxu1 }
 0x6b6   :  { %917 = vmatmul.mubr.msk.f32.vlgmr.msra.gmra.mrb[8].mxu0 %vm112_vm2, %v632_v49 }
 0x6b7   :  { %952 = vmatpush3.bf16.msra.mxu0 %v951_v48  ;;  %923 = vmatprep.mubr.msk.f32.mxu0 %vm984_vm1, %v983_v2 }
 0x6ba   :  { %924 = vmatmul.mubr.msk.f32.vlgmr.msra.gmra.mrb[10].mxu0 %vm112_vm2, %v632_v49 }
 0x789   :  { %v709_v54 = vpop.f32.mrb[8].mxu0 }
 0x78a   :  { %788 = vst.msk [vmem:[#allocation2] sm:$0xff] %vm265_vm3, %v709_v54  ;;  %v918_v55 = vpop.f32.mrb[9].mxu0 }
 0x78d   :  { %v779_v56 = vpop.f32.mrb[10].mxu0 }
 0x78e   :  { %789 = vst.msk [vmem:[#allocation2 + $0x8] sm:$0xff] %vm265_vm3, %v779_v56  ;;  %v925_v57 = vpop.f32.mrb[11].mxu0 }
 0x78f   :  { %970 = shalt.err (!%p967_p4)
}
 0x790   :  { %s971_s13 = scalar_lea.hbm %s1160_s7, 384 }
 0x791   :  { %p972_p5 = scmp.ne.s32.totalorder %s1160_s7, %s971_s13  ;;  %p975_p6 = scmp.lt.u32.totalorder %s971_s13, %s1160_s7 }
 0x793   :  { %p977_p7 = pnand %p975_p6, %p972_p5 }
 0x795   :  { %980 = shalt.err (!%p977_p7)
}
 0x796   :  { %s987_s17 = smov 128   ;;  %s988_s18 = smov 8  }
 0x797   :  { %802 = dma.vmem_to_hbm [thread:$0]  %s797_s10, 384, %s1160_s7, [#allocation3], %s987_s17, %s987_s17, %s988_s18  }
 0x798   :  { %981 = dma.done.wait [#allocation3], 384  }
 0x799   :  { %982 = vsyncadd [#allocation3], 4294966912 }
 0x79a   :  { %806 = vsyncpa [#allocation3], 1 }

</bundles_post_ra>
